<compile_context>
chip_gen: v5e
topology: v5e:2x2
jax: 0.10.0
libtpu: 0.0.40
codegen_flags: <defaults>
</compile_context>

<pallas_src>
import functools

import jax
import jax.numpy as jnp
from jax.experimental import pallas as pl
from jax.experimental.pallas import tpu as pltpu


def _fused_mlp_kernel(*refs, n_layers):
    """refs = (x_ref, w0_ref, b0_ref, ..., w{L-1}_ref, b{L-1}_ref, o_ref)."""
    x_ref = refs[0]
    o_ref = refs[-1]
    wb_refs = refs[1:-1]

    h = x_ref[...].astype(jnp.float32)
    for i in range(n_layers):
        w = wb_refs[2 * i][...]                        # (in, out), pre-transposed
        b = wb_refs[2 * i + 1][...].astype(jnp.float32)  # (1, out) — broadcasts over rows
        h = jnp.dot(h, w, preferred_element_type=jnp.float32) + b
        if i < n_layers - 1:
            # sigmoid(h) == 0.5 * tanh(0.5 * h) + 0.5 : one EUP op per element
            h = 0.5 * jnp.tanh(0.5 * h) + 0.5
    o_ref[...] = h.astype(o_ref.dtype)


def mnist_net_forward(x, params, *, block_m=256):
    """x: (M, 784). params: list of (w_t: (in, out), b: (1, out)) — pre-transposed."""
    M, K = x.shape
    n_layers = len(params)
    N_out = params[-1][0].shape[1]

    flat_params = []
    for w_t, b in params:
        assert b.shape == (1, w_t.shape[1])
        flat_params += [w_t, b]

    kernel = functools.partial(_fused_mlp_kernel, n_layers=n_layers)
    out_shape = jax.ShapeDtypeStruct((M, N_out), x.dtype)

    if M <= block_m:
        # Small batch: single invocation, no grid — all operands live whole in VMEM.
        return pl.pallas_call(kernel, out_shape=out_shape)(x, *flat_params)

    # Large batch: tile the batch (M) axis. Ragged tails are handled by cdiv — the
    # partial last tile is masked on store and each output row depends only on its
    # own input row, so padding rows never contaminate valid results.
    in_specs = [pl.BlockSpec((block_m, K), lambda i: (i, 0))]
    for w_t, b in params:
        k_in, k_out = w_t.shape
        in_specs.append(pl.BlockSpec((k_in, k_out), lambda i: (0, 0)))
        in_specs.append(pl.BlockSpec((1, k_out), lambda i: (0, 0)))
    out_specs = pl.BlockSpec((block_m, N_out), lambda i: (i, 0))

    return pl.pallas_call(
        kernel,
        out_shape=out_shape,
        grid=(pl.cdiv(M, block_m),),
        in_specs=in_specs,
        out_specs=out_specs,
        compiler_params=pltpu.CompilerParams(dimension_semantics=("parallel",)),
    )(x, *flat_params)


def init_mnist_net_params(key, n_hidden_neurons, n_hidden_layers, dtype=jnp.float32):
    """PyTorch nn.Linear default init: U[-1/sqrt(fan_in), 1/sqrt(fan_in)].

    Weights sampled PyTorch-style as (out, in) then transposed ONCE to (in, out);
    biases stored as (1, out) so the forward pass emits no reshape/transpose ops.
    """
    dims = [28 * 28] + [n_hidden_neurons] * n_hidden_layers + [10]
    params = []
    for i in range(len(dims) - 1):
        fan_in, fan_out = dims[i], dims[i + 1]
        key, wk, bk = jax.random.split(key, 3)
        bound = 1.0 / jnp.sqrt(jnp.float32(fan_in))
        w = jax.random.uniform(wk, (fan_out, fan_in), jnp.float32, -bound, bound)
        b = jax.random.uniform(bk, (fan_out,), jnp.float32, -bound, bound)
        params.append((w.T.astype(dtype), b.reshape(1, -1).astype(dtype)))
    return params


def _ref_forward(x, params):
    """Pure-JAX reference (same math, jax.nn.sigmoid)."""
    h = x
    for idx, (w_t, b) in enumerate(params):
        h = h @ w_t + b
        if idx < len(params) - 1:
            h = jax.nn.sigmoid(h)
    return h


if __name__ == "__main__":
    n_hidden_neurons = 32
    n_hidden_layers = 2

    key = jax.random.PRNGKey(0)
    key, xkey, pkey = jax.random.split(key, 3)

    params = init_mnist_net_params(pkey, n_hidden_neurons, n_hidden_layers)

    # --- small batch: single un-gridded invocation -------------------------------
    x_small = jax.random.normal(xkey, (8, 28 * 28), dtype=jnp.float32)
    fwd = jax.jit(mnist_net_forward)
    out_small = jax.block_until_ready(fwd(x_small, params))
    ref_small = _ref_forward(x_small, params)
    assert out_small.shape == (8, 10)
    assert jnp.allclose(out_small, ref_small, atol=5e-3, rtol=5e-3), float(
        jnp.max(jnp.abs(out_small - ref_small)))

    # --- larger batch: exercise the batch-tiled (gridded) path -------------------
    key, xkey2 = jax.random.split(key)
    x_big = jax.random.normal(xkey2, (384, 28 * 28), dtype=jnp.float32)
    fwd_big = jax.jit(functools.partial(mnist_net_forward, block_m=128))
    out_big = jax.block_until_ready(fwd_big(x_big, params))
    ref_big = _ref_forward(x_big, params)
    assert out_big.shape == (384, 10)
    assert jnp.allclose(out_big, ref_big, atol=5e-3, rtol=5e-3), float(
        jnp.max(jnp.abs(out_big - ref_big)))

    print("KERNEL_OK")
</pallas_src>

<mosaic_0001>
module attributes {stable_mosaic.version = 11 : i64} {
  func.func @_fused_mlp_kernel(%arg0: memref<8x784xf32, #tpu.memory_space<vmem>>, %arg1: memref<784x32xf32, #tpu.memory_space<vmem>>, %arg2: memref<1x32xf32, #tpu.memory_space<vmem>>, %arg3: memref<32x32xf32, #tpu.memory_space<vmem>>, %arg4: memref<1x32xf32, #tpu.memory_space<vmem>>, %arg5: memref<32x10xf32, #tpu.memory_space<vmem>>, %arg6: memref<1x10xf32, #tpu.memory_space<vmem>>, %arg7: memref<8x10xf32, #tpu.memory_space<vmem>>) attributes {dimension_semantics = [], scalar_prefetch = 0 : i64, scratch_operands = 0 : i64, tpu.core_type = #tpu.core_type<tc>} {
    %c0 = arith.constant 0 : index
    %c0_0 = arith.constant 0 : index
    %0 = vector.load %arg0[%c0, %c0_0] : memref<8x784xf32, #tpu.memory_space<vmem>>, vector<8x784xf32>
    %c0_1 = arith.constant 0 : index
    %c0_2 = arith.constant 0 : index
    %1 = vector.load %arg1[%c0_1, %c0_2] : memref<784x32xf32, #tpu.memory_space<vmem>>, vector<784x32xf32>
    %c0_3 = arith.constant 0 : index
    %c0_4 = arith.constant 0 : index
    %2 = vector.load %arg2[%c0_3, %c0_4] : memref<1x32xf32, #tpu.memory_space<vmem>>, vector<1x32xf32>
    %cst = arith.constant dense<0.000000e+00> : vector<8x32xf32>
    %3 = tpu.matmul %0, %1, %cst {dimension_numbers = #tpu.dot_dimension_numbers<[1], [0], [0], [1], [0, 0, 1, 1], [], []>} : vector<8x784xf32>, vector<784x32xf32>, vector<8x32xf32> -> vector<8x32xf32>
    %4 = vector.broadcast %2 : vector<1x32xf32> to vector<8x32xf32>
    %5 = arith.addf %3, %4 : vector<8x32xf32>
    %cst_5 = arith.constant 5.000000e-01 : f32
    %6 = vector.broadcast %cst_5 : f32 to vector<8x32xf32>
    %7 = arith.mulf %6, %5 : vector<8x32xf32>
    %8 = math.tanh %7 : vector<8x32xf32>
    %cst_6 = arith.constant 5.000000e-01 : f32
    %9 = vector.broadcast %cst_6 : f32 to vector<8x32xf32>
    %10 = arith.mulf %9, %8 : vector<8x32xf32>
    %cst_7 = arith.constant 5.000000e-01 : f32
    %11 = vector.broadcast %cst_7 : f32 to vector<8x32xf32>
    %12 = arith.addf %10, %11 : vector<8x32xf32>
    %c0_8 = arith.constant 0 : index
    %c0_9 = arith.constant 0 : index
    %13 = vector.load %arg3[%c0_8, %c0_9] : memref<32x32xf32, #tpu.memory_space<vmem>>, vector<32x32xf32>
    %c0_10 = arith.constant 0 : index
    %c0_11 = arith.constant 0 : index
    %14 = vector.load %arg4[%c0_10, %c0_11] : memref<1x32xf32, #tpu.memory_space<vmem>>, vector<1x32xf32>
    %cst_12 = arith.constant dense<0.000000e+00> : vector<8x32xf32>
    %15 = tpu.matmul %12, %13, %cst_12 {dimension_numbers = #tpu.dot_dimension_numbers<[1], [0], [0], [1], [0, 0, 1, 1], [], []>} : vector<8x32xf32>, vector<32x32xf32>, vector<8x32xf32> -> vector<8x32xf32>
    %16 = vector.broadcast %14 : vector<1x32xf32> to vector<8x32xf32>
    %17 = arith.addf %15, %16 : vector<8x32xf32>
    %cst_13 = arith.constant 5.000000e-01 : f32
    %18 = vector.broadcast %cst_13 : f32 to vector<8x32xf32>
    %19 = arith.mulf %18, %17 : vector<8x32xf32>
    %20 = math.tanh %19 : vector<8x32xf32>
    %cst_14 = arith.constant 5.000000e-01 : f32
    %21 = vector.broadcast %cst_14 : f32 to vector<8x32xf32>
    %22 = arith.mulf %21, %20 : vector<8x32xf32>
    %cst_15 = arith.constant 5.000000e-01 : f32
    %23 = vector.broadcast %cst_15 : f32 to vector<8x32xf32>
    %24 = arith.addf %22, %23 : vector<8x32xf32>
    %c0_16 = arith.constant 0 : index
    %c0_17 = arith.constant 0 : index
    %25 = vector.load %arg5[%c0_16, %c0_17] : memref<32x10xf32, #tpu.memory_space<vmem>>, vector<32x10xf32>
    %c0_18 = arith.constant 0 : index
    %c0_19 = arith.constant 0 : index
    %26 = vector.load %arg6[%c0_18, %c0_19] : memref<1x10xf32, #tpu.memory_space<vmem>>, vector<1x10xf32>
    %cst_20 = arith.constant dense<0.000000e+00> : vector<8x10xf32>
    %27 = tpu.matmul %24, %25, %cst_20 {dimension_numbers = #tpu.dot_dimension_numbers<[1], [0], [0], [1], [0, 0, 1, 1], [], []>} : vector<8x32xf32>, vector<32x10xf32>, vector<8x10xf32> -> vector<8x10xf32>
    %28 = vector.broadcast %26 : vector<1x10xf32> to vector<8x10xf32>
    %29 = arith.addf %27, %28 : vector<8x10xf32>
    %c0_21 = arith.constant 0 : index
    %c0_22 = arith.constant 0 : index
    %30 = vector.load %arg7[%c0_21, %c0_22] : memref<8x10xf32, #tpu.memory_space<vmem>>, vector<8x10xf32>
    tpu.vector_store %arg7[%c0_21, %c0_22], %29 {strides = array<i32>} : memref<8x10xf32, #tpu.memory_space<vmem>>, vector<8x10xf32>,
    return
  }
}

</mosaic_0001>

<bundles_post_ra>
// kernel: mnist_net_forward.1
= control target key start
LH: loop header
LB: loop body
LE: loop exit
PB: predicated region body
PF: predicated region fallthrough
CT: control target
= control target key end

     0   :  { %s800_s0 = inlined_call_operand.vmem [shape: f32[8,784], index: 0, kind: input, shape index: {}]   ;;  %s801_s1 = inlined_call_operand.vmem [shape: f32[784,32], index: 1, kind: input, shape index: {}]   ;;  %s802_s2 = inlined_call_operand.vmem [shape: f32[1,32], index: 2, kind: input, shape index: {}]   ;;  %s803_s3 = inlined_call_operand.vmem [shape: f32[32,32], index: 3, kind: input, shape index: {}]   ;;  %s804_s4 = inlined_call_operand.vmem [shape: f32[1,32], index: 4, kind: input, shape index: {}]   ;;  %s805_s5 = inlined_call_operand.vmem [shape: f32[32,10], index: 5, kind: input, shape index: {}]   ;;  %s806_s6 = inlined_call_operand.vmem [shape: f32[1,10], index: 6, kind: input, shape index: {}]   ;;  %s807_s7 = inlined_call_operand.hbm [shape: f32[8,10], index: 7, kind: output, shape index: {}]  }
   0x1   :  { %v49_v0 = vld [vmem:[%s801_s1 + $0x78] sm:$0xff]  ;;  %v48_v1 = vld [vmem:[%s801_s1 + $0x70] sm:$0xff]  ;;  %v47_v4 = vld [vmem:[%s801_s1 + $0x68] sm:$0xff] }
   0x2   :  { %v65_v2 = vld [vmem:[%s801_s1 + $0xf8] sm:$0xff]  ;;  %140 = vmatpush.msra.mxu0 %v49_v0  ;;  %v64_v3 = vld [vmem:[%s801_s1 + $0xf0] sm:$0xff]  ;;  %v63_v5 = vld [vmem:[%s801_s1 + $0xe8] sm:$0xff] }
   0x3   :  { %160 = vmatpush.msra.mxu1 %v65_v2  ;;  %v46_v6 = vld [vmem:[%s801_s1 + $0x60] sm:$0xff]  ;;  %v45_v8 = vld [vmem:[%s801_s1 + $0x58] sm:$0xff]  ;;  %v44_v10 = vld [vmem:[%s801_s1 + $0x50] sm:$0xff] }
   0x4   :  { %141 = vmatpush.msra.mxu0 %v48_v1  ;;  %v62_v7 = vld [vmem:[%s801_s1 + $0xe0] sm:$0xff]  ;;  %v61_v9 = vld [vmem:[%s801_s1 + $0xd8] sm:$0xff]  ;;  %v60_v12 = vld [vmem:[%s801_s1 + $0xd0] sm:$0xff] }
   0x5   :  { %161 = vmatpush.msra.mxu1 %v64_v3  ;;  %v81_v11 = vld [vmem:[%s801_s1 + $0x178] sm:$0xff]  ;;  %v80_v13 = vld [vmem:[%s801_s1 + $0x170] sm:$0xff]  ;;  %v79_v15 = vld [vmem:[%s801_s1 + $0x168] sm:$0xff] }
   0x6   :  { %142 = vmatpush.msra.mxu0 %v47_v4  ;;  %180 = vmatpush.msra.mxu2 %v81_v11  ;;  %v97_v14 = vld [vmem:[%s801_s1 + $0x1f8] sm:$0xff]  ;;  %v96_v16 = vld [vmem:[%s801_s1 + $0x1f0] sm:$0xff]  ;;  %v43_v17 = vld [vmem:[%s801_s1 + $0x48] sm:$0xff] }
   0x7   :  { %162 = vmatpush.msra.mxu1 %v63_v5  ;;  %v59_v18 = vld [vmem:[%s801_s1 + $0xc8] sm:$0xff]  ;;  %200 = vmatpush.msra.mxu3 %v97_v14  ;;  %v78_v19 = vld [vmem:[%s801_s1 + $0x160] sm:$0xff]  ;;  %v77_v23 = vld [vmem:[%s801_s1 + $0x158] sm:$0xff] }
   0x8   :  { %143 = vmatpush.msra.mxu0 %v46_v6  ;;  %181 = vmatpush.msra.mxu2 %v80_v13  ;;  %v95_v20 = vld [vmem:[%s801_s1 + $0x1e8] sm:$0xff]  ;;  %v42_v21 = vld [vmem:[%s801_s1 + $0x40] sm:$0xff]  ;;  %v41_v25 = vld [vmem:[%s801_s1 + $0x38] sm:$0xff] }
   0x9   :  { %163 = vmatpush.msra.mxu1 %v62_v7  ;;  %v58_v22 = vld [vmem:[%s801_s1 + $0xc0] sm:$0xff]  ;;  %201 = vmatpush.msra.mxu3 %v96_v16  ;;  %v57_v26 = vld [vmem:[%s801_s1 + $0xb8] sm:$0xff]  ;;  %v76_v27 = vld [vmem:[%s801_s1 + $0x150] sm:$0xff] }
   0xa   :  { %144 = vmatpush.msra.mxu0 %v45_v8  ;;  %182 = vmatpush.msra.mxu2 %v79_v15  ;;  %v94_v24 = vld [vmem:[%s801_s1 + $0x1e0] sm:$0xff]  ;;  %v93_v28 = vld [vmem:[%s801_s1 + $0x1d8] sm:$0xff]  ;;  %v40_v29 = vld [vmem:[%s801_s1 + $0x30] sm:$0xff] }
   0xb   :  { %164 = vmatpush.msra.mxu1 %v61_v9  ;;  %202 = vmatpush.msra.mxu3 %v95_v20  ;;  %v56_v30 = vld [vmem:[%s801_s1 + $0xb0] sm:$0xff]  ;;  %v75_v31 = vld [vmem:[%s801_s1 + $0x148] sm:$0xff]  ;;  %v74_v35 = vld [vmem:[%s801_s1 + $0x140] sm:$0xff] }
   0xc   :  { %145 = vmatpush.msra.mxu0 %v44_v10  ;;  %183 = vmatpush.msra.mxu2 %v78_v19  ;;  %v92_v32 = vld [vmem:[%s801_s1 + $0x1d0] sm:$0xff]  ;;  %v39_v33 = vld [vmem:[%s801_s1 + $0x28] sm:$0xff]  ;;  %v38_v37 = vld [vmem:[%s801_s1 + $0x20] sm:$0xff] }
   0xd   :  { %165 = vmatpush.msra.mxu1 %v60_v12  ;;  %203 = vmatpush.msra.mxu3 %v94_v24  ;;  %v55_v34 = vld [vmem:[%s801_s1 + $0xa8] sm:$0xff]  ;;  %v54_v38 = vld [vmem:[%s801_s1 + $0xa0] sm:$0xff]  ;;  %v73_v39 = vld [vmem:[%s801_s1 + $0x138] sm:$0xff] }
   0xe   :  { %146 = vmatpush.msra.mxu0 %v43_v17  ;;  %184 = vmatpush.msra.mxu2 %v77_v23  ;;  %v91_v36 = vld [vmem:[%s801_s1 + $0x1c8] sm:$0xff]  ;;  %v90_v40 = vld [vmem:[%s801_s1 + $0x1c0] sm:$0xff]  ;;  %v37_v41 = vld [vmem:[%s801_s1 + $0x18] sm:$0xff] }
   0xf   :  { %166 = vmatpush.msra.mxu1 %v59_v18  ;;  %204 = vmatpush.msra.mxu3 %v93_v28  ;;  %v53_v42 = vld [vmem:[%s801_s1 + $0x98] sm:$0xff]  ;;  %v72_v43 = vld [vmem:[%s801_s1 + $0x130] sm:$0xff]  ;;  %v71_v47 = vld [vmem:[%s801_s1 + $0x128] sm:$0xff] }
  0x10   :  { %147 = vmatpush.msra.mxu0 %v42_v21  ;;  %185 = vmatpush.msra.mxu2 %v76_v27  ;;  %v89_v44 = vld [vmem:[%s801_s1 + $0x1b8] sm:$0xff]  ;;  %v36_v45 = vld [vmem:[%s801_s1 + $0x10] sm:$0xff]  ;;  %v35_v49 = vld [vmem:[%s801_s1 + $0x8] sm:$0xff] }
  0x11   :  { %167 = vmatpush.msra.mxu1 %v58_v22  ;;  %205 = vmatpush.msra.mxu3 %v92_v32  ;;  %v52_v46 = vld [vmem:[%s801_s1 + $0x90] sm:$0xff]  ;;  %v51_v50 = vld [vmem:[%s801_s1 + $0x88] sm:$0xff]  ;;  %v70_v51 = vld [vmem:[%s801_s1 + $0x120] sm:$0xff] }
  0x12   :  { %148 = vmatpush.msra.mxu0 %v41_v25  ;;  %186 = vmatpush.msra.mxu2 %v75_v31  ;;  %v88_v48 = vld [vmem:[%s801_s1 + $0x1b0] sm:$0xff]  ;;  %v87_v52 = vld [vmem:[%s801_s1 + $0x1a8] sm:$0xff]  ;;  %v34_v53 = vld [vmem:[%s801_s1] sm:$0xff] }
  0x13   :  { %168 = vmatpush.msra.mxu1 %v57_v26  ;;  %206 = vmatpush.msra.mxu3 %v91_v36  ;;  %v50_v54 = vld [vmem:[%s801_s1 + $0x80] sm:$0xff]  ;;  %v113_v55 = vld [vmem:[%s801_s1 + $0x278] sm:$0xff]  ;;  %v112_v59 = vld [vmem:[%s801_s1 + $0x270] sm:$0xff] }
  0x14   :  { %149 = vmatpush.msra.mxu0 %v40_v29  ;;  %187 = vmatpush.msra.mxu2 %v74_v35  ;;  %v129_v56 = vld [vmem:[%s801_s1 + $0x2f8] sm:$0xff]  ;;  %v86_v58 = vld [vmem:[%s801_s1 + $0x1a0] sm:$0xff]  ;;  %v128_v60 = vld [vmem:[%s801_s1 + $0x2f0] sm:$0xff] }
  0x15   :  { %169 = vmatpush.msra.mxu1 %v56_v30  ;;  %207 = vmatpush.msra.mxu3 %v90_v40  ;;  %v69_v57 = vld [vmem:[%s801_s1 + $0x118] sm:$0xff]  ;;  %v68_v61 = vld [vmem:[%s801_s1 + $0x110] sm:$0xff]  ;;  %v111_v63 = vld [vmem:[%s801_s1 + $0x268] sm:$0xff] }
  0x16   :  { %150 = vmatpush.msra.mxu0 %v39_v33  ;;  %188 = vmatpush.msra.mxu2 %v73_v39  ;;  %v85_v62 = vld [vmem:[%s801_s1 + $0x198] sm:$0xff]  ;;  %v110_v0 = vld [vmem:[%s801_s1 + $0x260] sm:$0xff]  ;;  %v127_v1 = vld [vmem:[%s801_s1 + $0x2e8] sm:$0xff] }
  0x17   :  { %170 = vmatpush.msra.mxu1 %v55_v34  ;;  %208 = vmatpush.msra.mxu3 %v89_v44  ;;  %v126_v2 = vld [vmem:[%s801_s1 + $0x2e0] sm:$0xff]  ;;  %v67_v3 = vld [vmem:[%s801_s1 + $0x108] sm:$0xff]  ;;  %v84_v4 = vld [vmem:[%s801_s1 + $0x190] sm:$0xff] }
  0x18   :  { %151 = vmatpush.msra.mxu0 %v38_v37  ;;  %189 = vmatpush.msra.mxu2 %v72_v43  ;;  %v66_v5 = vld [vmem:[%s801_s1 + $0x100] sm:$0xff]  ;;  %v83_v6 = vld [vmem:[%s801_s1 + $0x188] sm:$0xff] }
  0x19   :  { %171 = vmatpush.msra.mxu1 %v54_v38  ;;  %209 = vmatpush.msra.mxu3 %v88_v48 }
  0x1a   :  { %152 = vmatpush.msra.mxu0 %v37_v41  ;;  %190 = vmatpush.msra.mxu2 %v71_v47 }
  0x1b   :  { %172 = vmatpush.msra.mxu1 %v53_v42  ;;  %210 = vmatpush.msra.mxu3 %v87_v52 }
  0x1c   :  { %153 = vmatpush.msra.mxu0 %v36_v45  ;;  %191 = vmatpush.msra.mxu2 %v70_v51 }
  0x1d   :  { %173 = vmatpush.msra.mxu1 %v52_v46  ;;  %211 = vmatpush.msra.mxu3 %v86_v58 }
  0x1e   :  { %154 = vmatpush.msra.mxu0 %v35_v49  ;;  %192 = vmatpush.msra.mxu2 %v69_v57 }
  0x1f   :  { %174 = vmatpush.msra.mxu1 %v51_v50  ;;  %212 = vmatpush.msra.mxu3 %v85_v62 }
  0x20   :  { %155 = vmatpush.msra.mxu0 %v34_v53  ;;  %193 = vmatpush.msra.mxu2 %v68_v61 }
  0x21   :  { %175 = vmatpush.msra.mxu1 %v50_v54 }
  0x22   :  { %220 = vmatpush.msrb.mxu0 %v113_v55 }
  0x23   :  { %240 = vmatpush.msrb.mxu1 %v129_v56 }
  0x24   :  { %221 = vmatpush.msrb.mxu0 %v112_v59 }
  0x25   :  { %241 = vmatpush.msrb.mxu1 %v128_v60 }
  0x26   :  { %222 = vmatpush.msrb.mxu0 %v111_v63 }
  0x27   :  { %242 = vmatpush.msrb.mxu1 %v127_v1 }
  0x28   :  { %12 = vsyncpa [#allocation3], 0  ;;  %v109_v7 = vld [vmem:[%s801_s1 + $0x258] sm:$0xff]  ;;  %194 = vmatpush.msra.mxu2 %v67_v3  ;;  %213 = vmatpush.msra.mxu3 %v84_v4  ;;  %v29_v9 = vld [vmem:[%s800_s0 + $0x10] sm:$0xff]  ;;  %vm136_vm0 = vcmask 130048   ;;  %vm292_vm1 = vcmask 261120  }
  0x29   :  { %v125_v8 = vld [vmem:[%s801_s1 + $0x2d8] sm:$0xff]  ;;  %223 = vmatpush.msrb.mxu0 %v110_v0  ;;  %243 = vmatpush.msrb.mxu1 %v126_v2  ;;  %v82_v10 = vld [vmem:[%s801_s1 + $0x180] sm:$0xff]  ;;  %v108_v11 = vld [vmem:[%s801_s1 + $0x250] sm:$0xff]  ;;  %s406_s22 = smov [#allocation2]   ;;  %s360_s25 = sshll.u32 %s807_s7, 4  ;;  %vm351_vm2 = vcmask 80896   ;;  %s361_s25 = int_to_ptr.hbm [resolvable:$true] %s360_s25 }
  0x2a   :  { %v124_v12 = vld [vmem:[%s801_s1 + $0x2d0] sm:$0xff]  ;;  %195 = vmatpush.msra.mxu2 %v66_v5  ;;  %214 = vmatpush.msra.mxu3 %v83_v6  ;;  %v131_v13 = vld [vmem:[%s801_s1 + $0x308] sm:$0xff]  ;;  %v27_v14 = vld [vmem:[%s800_s0] sm:$0xff] }
  0x2b   :  { %224 = vmatpush.msrb.mxu0 %v109_v7  ;;  %244 = vmatpush.msrb.mxu1 %v125_v8  ;;  %v107_v15 = vld [vmem:[%s801_s1 + $0x248] sm:$0xff]  ;;  %v30_v17 = vld [vmem:[%s800_s0 + $0x18] sm:$0xff]  ;;  %v106_v19 = vld [vmem:[%s801_s1 + $0x240] sm:$0xff] }
  0x2c   :  { %v123_v16 = vld [vmem:[%s801_s1 + $0x2c8] sm:$0xff]  ;;  %196 = vmatmul.f32.vlgmr.msra.gmra.mxu2 %v29_v9  ;;  %215 = vmatpush.msra.mxu3 %v82_v10  ;;  %v122_v20 = vld [vmem:[%s801_s1 + $0x2c0] sm:$0xff]  ;;  %v105_v22 = vld [vmem:[%s801_s1 + $0x238] sm:$0xff] }
  0x2d   :  { %225 = vmatpush.msrb.mxu0 %v108_v11  ;;  %245 = vmatpush.msrb.mxu1 %v124_v12  ;;  %v28_v18 = vld [vmem:[%s800_s0 + $0x8] sm:$0xff]  ;;  %v130_v21 = vld [vmem:[%s801_s1 + $0x300] sm:$0xff]  ;;  %v121_v23 = vld [vmem:[%s801_s1 + $0x2b8] sm:$0xff] }
  0x2e   :  { %274 = vmatpush.msrb.mxu2 %v131_v13  ;;  %156 = vmatmul.f32.vlgmr.msra.gmra.mxu0 %v27_v14  ;;  %v33_v24 = vld [vmem:[%s800_s0 + $0x30] sm:$0xff]  ;;  %v103_v27 = vld [vmem:[%s801_s1 + $0x228] sm:$0xff]  ;;  %v102_v29 = vld [vmem:[%s801_s1 + $0x220] sm:$0xff] }
  0x2f   :  { %226 = vmatpush.msrb.mxu0 %v107_v15  ;;  %246 = vmatpush.msrb.mxu1 %v123_v16  ;;  %v104_v25 = vld [vmem:[%s801_s1 + $0x230] sm:$0xff]  ;;  %v119_v28 = vld [vmem:[%s801_s1 + $0x2a8] sm:$0xff]  ;;  %v118_v30 = vld [vmem:[%s801_s1 + $0x2a0] sm:$0xff] }
  0x30   :  { %216 = vmatmul.f32.vlgmr.msra.gmra.mxu3 %v30_v17  ;;  %176 = vmatmul.f32.vlgmr.msra.gmra.mxu1 %v28_v18  ;;  %v120_v26 = vld [vmem:[%s801_s1 + $0x2b0] sm:$0xff]  ;;  %v101_v31 = vld [vmem:[%s801_s1 + $0x218] sm:$0xff]  ;;  %v99_v35 = vld [vmem:[%s801_s1 + $0x208] sm:$0xff] }
  0x31   :  { %227 = vmatpush.msrb.mxu0 %v106_v19  ;;  %247 = vmatpush.msrb.mxu1 %v122_v20  ;;  %v117_v32 = vld [vmem:[%s801_s1 + $0x298] sm:$0xff]  ;;  %v100_v33 = vld [vmem:[%s801_s1 + $0x210] sm:$0xff]  ;;  %v115_v36 = vld [vmem:[%s801_s1 + $0x288] sm:$0xff] }
  0x32   :  { %275 = vmatpush.msrb.mxu2 %v130_v21  ;;  %v116_v34 = vld [vmem:[%s801_s1 + $0x290] sm:$0xff]  ;;  %v98_v37 = vld [vmem:[%s801_s1 + $0x200] sm:$0xff]  ;;  %v32_v40 = vld [vmem:[%s800_s0 + $0x28] sm:$0xff] }
  0x33   :  { %228 = vmatpush.msrb.mxu0 %v105_v22  ;;  %248 = vmatpush.msrb.mxu1 %v121_v23  ;;  %v114_v38 = vld [vmem:[%s801_s1 + $0x280] sm:$0xff]  ;;  %v287_v41 = vld [vmem:[%s803_s3 + $0x18] sm:$0xff]  ;;  %v286_v44 = vld [vmem:[%s803_s3 + $0x10] sm:$0xff] }
  0x34   :  { %369 = vmatmul.msk.f32.vlgmr.msrb.gmra.mxu2 %vm136_vm0, %v33_v24  ;;  %v31_v39 = vld [vmem:[%s800_s0 + $0x20] sm:$0xff]  ;;  %308 = vmatpush.msrb.mxu3 %v287_v41  ;;  %v285_v45 = vld [vmem:[%s803_s3 + $0x8] sm:$0xff]  ;;  %v323_v0 = vld [vmem:[%s805_s5 + $0x18] sm:$0xff] }
  0x35   :  { %229 = vmatpush.msrb.mxu0 %v104_v25  ;;  %249 = vmatpush.msrb.mxu1 %v120_v26  ;;  %v373_v42 = vld [vmem:[%s802_s2] ss:$0 sm:$0xff]  ;;  %v322_v1 = vld [vmem:[%s805_s5 + $0x10] sm:$0xff]  ;;  %v321_v2 = vld [vmem:[%s805_s5 + $0x8] sm:$0xff] }
  0x36   :  { %309 = vmatpush.msrb.mxu3 %v286_v44  ;;  %v284_v48 = vld [vmem:[%s803_s3] sm:$0xff]  ;;  %343 = vmatpush.msra.mxu2 %v323_v0 }
  0x37   :  { %230 = vmatpush.msrb.mxu0 %v103_v27  ;;  %250 = vmatpush.msrb.mxu1 %v119_v28  ;;  %v320_v3 = vld [vmem:[%s805_s5] sm:$0xff]  ;;  %s358_s5 = sshll.u32 %s406_s22, 4  ;;  %s359_s5 = int_to_ptr.vmem [resolvable:$true] %s358_s5 }
  0x38   :  { %310 = vmatpush.msrb.mxu3 %v285_v45  ;;  %344 = vmatpush.msra.mxu2 %v322_v1  ;;  %v374_v4 = vld [vmem:[%s804_s4] ss:$0 sm:$0xff] }
  0x39   :  { %231 = vmatpush.msrb.mxu0 %v102_v29  ;;  %251 = vmatpush.msrb.mxu1 %v118_v30  ;;  %v375_v11 = vld [vmem:[%s806_s6] ss:$0 sm:$0xff] }
  0x3a   :  { %311 = vmatpush.msrb.mxu3 %v284_v48  ;;  %345 = vmatpush.msra.mxu2 %v321_v2 }
  0x3b   :  { %232 = vmatpush.msrb.mxu0 %v101_v31  ;;  %252 = vmatpush.msrb.mxu1 %v117_v32 }
  0x3c   :  { %346 = vmatpush.msra.mxu2 %v320_v3 }
  0x3d   :  { %233 = vmatpush.msrb.mxu0 %v100_v33  ;;  %253 = vmatpush.msrb.mxu1 %v116_v34 }
  0x3f   :  { %234 = vmatpush.msrb.mxu0 %v99_v35  ;;  %254 = vmatpush.msrb.mxu1 %v115_v36 }
  0x41   :  { %235 = vmatpush.msrb.mxu0 %v98_v37  ;;  %255 = vmatpush.msrb.mxu1 %v114_v38 }
  0x42   :  { %236 = vmatmul.f32.vlgmr.msrb.gmra.mxu0 %v31_v39  ;;  %256 = vmatmul.f32.vlgmr.msrb.gmra.mxu1 %v32_v40 }
  0xab   :  { %v157_v43 = vpop.f32.mrf.mxu0 }
  0xac   :  { %v158_v46 = vadd.f32 %v373_v42, %v157_v43 }
  0xad   :  { %v177_v47 = vpop.f32.mrf.mxu1 }
  0xae   :  { %v178_v49 = vadd.f32 %v177_v47, %v158_v46 }
  0xaf   :  { %v197_v50 = vpop.f32.mrf.mxu2 }
  0xb0   :  { %v198_v51 = vadd.f32 %v197_v50, %v178_v49 }
  0xb3   :  { %v217_v52 = vpop.f32.mrf.mxu3 }
  0xb4   :  { %v218_v53 = vadd.f32 %v217_v52, %v198_v51 }
  0xb7   :  { %v277_v57 = vpop.f32.mrf.mxu2 }
  0xbf   :  { %v237_v54 = vpop.f32.mrf.mxu0  ;;  %v257_v55 = vpop.f32.mrf.mxu1 }
  0xc0   :  { %v238_v56 = vadd.f32 %v237_v54, %v218_v53 }
  0xc2   :  { %v258_v58 = vadd.f32 %v257_v55, %v238_v56 }
  0xc4   :  { %v278_v59 = vadd.f32 %v277_v57, %v258_v58 }
  0xc6   :  { %v280_v60 = vmul.f32 0.5, %v278_v59 }
  0xc8   :  { %376 = vtanh.f32 %v280_v60 }
  0xce   :  { %v377_v61 = vpop.eup %376 }
  0xcf   :  { %v282_v62 = vmul.f32 0.5, %v377_v61 }
  0xd1   :  { %v283_v63 = vadd.f32 0.5, %v282_v62 }
  0xd3   :  { %370 = vmatmul.msk.f32.vlgmr.msrb.gmra.mxu3 %vm292_vm1, %v283_v63 }
 0x156   :  { %v313_v5 = vpop.f32.mrf.mxu3 }
 0x157   :  { %v314_v6 = vadd.f32 %v374_v4, %v313_v5 }
 0x159   :  { %v316_v7 = vmul.f32 0.5, %v314_v6 }
 0x15b   :  { %378 = vtanh.f32 %v316_v7 }
 0x161   :  { %v379_v8 = vpop.eup %378 }
 0x162   :  { %v318_v9 = vmul.f32 0.5, %v379_v8 }
 0x164   :  { %v319_v10 = vadd.f32 0.5, %v318_v9 }
 0x166   :  { %371 = vmatmul.msk.f32.vlgmr.msra.gmra.mxu2 %vm292_vm1, %v319_v10 }
 0x1e9   :  { %v348_v12 = vpop.f32.mrf.mxu2 }
 0x1ea   :  { %v349_v13 = vadd.f32 %v375_v11, %v348_v12 }
 0x1ec   :  { %352 = vst.msk [vmem:[#allocation2] sm:$0xff] %vm351_vm2, %v349_v13 }
 0x1ed   :  { %363 = dma.vmem_to_hbm [thread:$0]  %s359_s5, 128, %s361_s25, [#allocation3]  }
 0x1ee   :  { %404 = dma.done.wait [#allocation3], 128  }
 0x1ef   :  { %405 = vsyncadd [#allocation3], 4294967168 }
 0x1f0   :  { %368 = vsyncpa [#allocation3], 1 }

</bundles_post_ra>
